<compile_context>
chip_gen: v6e
topology: v6e:2x2x1
jax: 0.10.0
libtpu: 0.0.40
codegen_flags: <defaults>
</compile_context>

<pallas_src>
import functools

import jax
import jax.numpy as jnp
from jax.experimental import pallas as pl
from jax.experimental.pallas import tpu as pltpu

_LANE = 128


def _squash_kernel(x_ref, o_ref, *, scale, offset):
    # Fused form of (x - in_min) / in_scale * out_scale + out_min
    # == x * scale + offset  (reassociated; differs from PyTorch order by ~1 ulp)
    o_ref[...] = x_ref[...] * scale + offset


def _sublane_multiple(dtype):
    itemsize = jnp.dtype(dtype).itemsize
    return 8 * max(1, 4 // itemsize)  # f32 -> 8, bf16 -> 16, int8/fp8 -> 32


def _choose_lane_width(n):
    # Widest lane-dense width that divides n exactly (no padding needed).
    for c in (4096, 2048, 1024, 512, 256, 128):
        if n % c == 0:
            return c
    return 0  # awkward size -> fall back to padded 128-lane slab


def squash(x, in_min, in_max, out_min, out_max):
    """Applies the Squash affine rescale elementwise via a Pallas TPU kernel."""
    in_scale = float(in_max) - float(in_min)
    out_scale = float(out_max) - float(out_min)
    # TODO(synk): no guard for in_max == in_min (div-by-zero), same as the PyTorch reference.
    scale = out_scale / in_scale
    offset = float(out_min) - float(in_min) * scale

    orig_shape = x.shape
    dtype = x.dtype
    flat = x.reshape(-1)
    n = flat.shape[0]

    c = _choose_lane_width(n)
    padded = False
    if c == 0:
        # Rare fallback: pad only the last partial lane row (one small pad + slice).
        c = _LANE
        pad_n = pl.cdiv(n, c) * c
        flat = jnp.pad(flat, (0, pad_n - n))
        padded = True
    x2d = flat.reshape(-1, c)
    rows = x2d.shape[0]

    sub = _sublane_multiple(dtype)
    itemsize = jnp.dtype(dtype).itemsize
    # ~2 MiB blocks: 4 double-buffered in/out buffers ~= 8 MiB, safe on every gen.
    target_block_bytes = 2 * 1024 * 1024
    block_rows = max(sub, (target_block_bytes // (c * itemsize)) // sub * sub)
    block_rows = min(block_rows, pl.cdiv(rows, sub) * sub)

    grid = (pl.cdiv(rows, block_rows),)

    kernel = functools.partial(_squash_kernel, scale=scale, offset=offset)

    out2d = pl.pallas_call(
        kernel,
        out_shape=jax.ShapeDtypeStruct((rows, c), dtype),
        grid_spec=pl.GridSpec(
            grid=grid,
            in_specs=[pl.BlockSpec((block_rows, c), lambda i: (i, 0))],
            out_specs=pl.BlockSpec((block_rows, c), lambda i: (i, 0)),
        ),
        compiler_params=pltpu.CompilerParams(
            dimension_semantics=("parallel",)),
    )(x2d)

    out_flat = out2d.reshape(-1)
    if padded:
        out_flat = out_flat[:n]
    return out_flat.reshape(orig_shape)


def squash_ref(x, in_min, in_max, out_min, out_max):
    """Pure-JAX reference matching the PyTorch forward exactly."""
    return (x - in_min) / (in_max - in_min) * (out_max - out_min) + out_min


if __name__ == "__main__":
    key = jax.random.PRNGKey(0)
    # Squash params: map inputs in [-1, 1] to outputs in [0, 10].
    in_min, in_max = -1.0, 1.0
    out_min, out_max = 0.0, 10.0

    x = jax.random.uniform(
        key, (2, 4, 16, 16), dtype=jnp.float32, minval=-1.0, maxval=1.0)

    y = squash(x, in_min, in_max, out_min, out_max)
    y = jax.block_until_ready(y)

    y_ref = squash_ref(x, in_min, in_max, out_min, out_max)
    assert y.shape == x.shape and y.dtype == x.dtype
    assert jnp.allclose(y, y_ref, atol=1e-5, rtol=1e-5), "mismatch vs reference"

    print("KERNEL_OK")
</pallas_src>

<mosaic_0001>
module attributes {stable_mosaic.version = 11 : i64} {
  func.func @_squash_kernel(%arg0: i32, %arg1: memref<8x2048xf32, #tpu.memory_space<vmem>>, %arg2: memref<8x2048xf32, #tpu.memory_space<vmem>>) attributes {dimension_semantics = [#tpu.dimension_semantics<parallel>], iteration_bounds = array<i64: 1>, scalar_prefetch = 0 : i64, scratch_operands = 0 : i64, tpu.core_type = #tpu.core_type<tc>, window_params = [{transform_indices = @transform_0, window_bounds = array<i64: 8, 2048>}, {transform_indices = @transform_1, window_bounds = array<i64: 8, 2048>}]} {
    %c0 = arith.constant 0 : index
    %c0_0 = arith.constant 0 : index
    %0 = vector.load %arg1[%c0, %c0_0] : memref<8x2048xf32, #tpu.memory_space<vmem>>, vector<8x2048xf32>
    %cst = arith.constant 5.000000e+00 : f32
    %1 = vector.broadcast %cst : f32 to vector<8x2048xf32>
    %2 = arith.mulf %0, %1 : vector<8x2048xf32>
    %cst_1 = arith.constant 5.000000e+00 : f32
    %3 = vector.broadcast %cst_1 : f32 to vector<8x2048xf32>
    %4 = arith.addf %2, %3 : vector<8x2048xf32>
    %c0_2 = arith.constant 0 : index
    %c0_3 = arith.constant 0 : index
    %5 = vector.load %arg2[%c0_2, %c0_3] : memref<8x2048xf32, #tpu.memory_space<vmem>>, vector<8x2048xf32>
    tpu.vector_store %arg2[%c0_2, %c0_3], %4 {strides = array<i32>} : memref<8x2048xf32, #tpu.memory_space<vmem>>, vector<8x2048xf32>,
    return
  }
  func.func @transform_0(%arg0: i32) -> (i32, i32) {
    %c0_i32 = arith.constant 0 : i32
    %c0_i32_0 = arith.constant 0 : i32
    return %arg0, %c0_i32 : i32, i32
  }
  func.func @transform_1(%arg0: i32) -> (i32, i32) {
    %c0_i32 = arith.constant 0 : i32
    %c0_i32_0 = arith.constant 0 : i32
    return %arg0, %c0_i32 : i32, i32
  }
}

</mosaic_0001>

<bundles_post_ra>
// kernel: tpu_custom_call.1
= control target key start
LH: loop header
LB: loop body
LE: loop exit
PB: predicated region body
PF: predicated region fallthrough
CT: control target
= control target key end

     0   :  { %6 = vsyncpa [#allocation3], 0  ;;  %s178_s0 = inlined_call_operand.hbm [shape: f32[1,2048], index: 0, kind: input, shape index: {}]   ;;  %s179_s1 = inlined_call_operand.hbm [shape: f32[1,2048], index: 1, kind: output, shape index: {}]  }
   0x1   :  { %7 = vsyncpa [#allocation4], 0 }
   0x2   :  { %12 = vsyncadd [#allocation3], 1792  ;;  %s152_s6 = smov [#allocation2]  }
   0x3   :  { %s13_s7 = sshll.u32 %s152_s6, 4  ;;  %s14_s7 = int_to_ptr.vmem [resolvable:$true] %s13_s7 }
   0x4   :  { %s116_s8 = scalar_lea.vmem %s14_s7, 256  ;;  %s120_s9 = scalar_lea.vmem %s14_s7, 2048 }
   0x5   :  { %p117_p0 = scmp.ne.s32.totalorder %s14_s7, %s116_s8  ;;  %p121_p1 = scmp.lt.s32.totalorder %s14_s7, %s14_s7 }
   0x6   :  { %p122_p2 = scmp.lt.s32.totalorder %s120_s9, %s116_s8 }
   0x8   :  { %p123_p3 = por %p122_p2, %p121_p1 }
   0xa   :  { %p124_p4 = pnand %p123_p3, %p117_p0 }
   0xc   :  { %127 = shalt.err (!%p124_p4)
}
   0xd   :  { %s153_s10 = smov 256   ;;  %s154_s11 = smov 16  }
   0xe   :  { %19 = dma.hbm_to_vmem [thread:$0]  %s178_s0, 256, %s14_s7, [#allocation3], %s153_s10, %s153_s10, %s154_s11  }
   0xf   :  { %148 = dma.done.wait [#allocation3], 2048  }
  0x10   :  { %149 = vsyncadd [#allocation3], 4294965248  ;;  %v23_v0 = vld [vmem:[#allocation2] sm:$0xff]  ;;  %v24_v1 = vld [vmem:[#allocation2 + $0x8] sm:$0xff] }
  0x11   :  { %v25_v2 = vld [vmem:[#allocation2 + $0x10] sm:$0xff]  ;;  %v39_v3 = vmul.f32 5.0, %v23_v0  ;;  %v40_v4 = vmul.f32 5.0, %v24_v1  ;;  %v26_v6 = vld [vmem:[#allocation2 + $0x18] sm:$0xff]  ;;  %v27_v7 = vld [vmem:[#allocation2 + $0x20] sm:$0xff] }
  0x12   :  { %v41_v5 = vmul.f32 5.0, %v25_v2  ;;  %v28_v8 = vld [vmem:[#allocation2 + $0x28] sm:$0xff]  ;;  %v42_v9 = vmul.f32 5.0, %v26_v6  ;;  %v43_v10 = vmul.f32 5.0, %v27_v7  ;;  %v29_v12 = vld [vmem:[#allocation2 + $0x30] sm:$0xff]  ;;  %v30_v13 = vld [vmem:[#allocation2 + $0x38] sm:$0xff] }
  0x13   :  { %v44_v11 = vmul.f32 5.0, %v28_v8  ;;  %v31_v14 = vld [vmem:[#allocation2 + $0x40] sm:$0xff]  ;;  %v55_v15 = vadd.f32 5.0, %v39_v3  ;;  %v56_v16 = vadd.f32 5.0, %v40_v4  ;;  %v45_v18 = vmul.f32 5.0, %v29_v12  ;;  %v32_v19 = vld [vmem:[#allocation2 + $0x48] sm:$0xff] }
  0x14   :  { %v57_v17 = vadd.f32 5.0, %v41_v5  ;;  %v33_v20 = vld [vmem:[#allocation2 + $0x50] sm:$0xff]  ;;  %v58_v21 = vadd.f32 5.0, %v42_v9  ;;  %v59_v22 = vadd.f32 5.0, %v43_v10  ;;  %v46_v24 = vmul.f32 5.0, %v30_v13  ;;  %v34_v25 = vld [vmem:[#allocation2 + $0x58] sm:$0xff] }
  0x15   :  { %v60_v23 = vadd.f32 5.0, %v44_v11  ;;  %v35_v26 = vld [vmem:[#allocation2 + $0x60] sm:$0xff]  ;;  %71 = vst [vmem:[#allocation5] sm:$0xff] %v55_v15  ;;  %72 = vst [vmem:[#allocation5 + $0x8] sm:$0xff] %v56_v16  ;;  %v61_v27 = vadd.f32 5.0, %v45_v18  ;;  %v47_v28 = vmul.f32 5.0, %v31_v14 }
  0x16   :  { %73 = vst [vmem:[#allocation5 + $0x10] sm:$0xff] %v57_v17  ;;  %v48_v29 = vmul.f32 5.0, %v32_v19  ;;  %v49_v30 = vmul.f32 5.0, %v33_v20  ;;  %v36_v31 = vld [vmem:[#allocation2 + $0x68] sm:$0xff]  ;;  %v37_v32 = vld [vmem:[#allocation2 + $0x70] sm:$0xff]  ;;  %74 = vst [vmem:[#allocation5 + $0x18] sm:$0xff] %v58_v21 }
  0x17   :  { %75 = vst [vmem:[#allocation5 + $0x20] sm:$0xff] %v59_v22  ;;  %76 = vst [vmem:[#allocation5 + $0x28] sm:$0xff] %v60_v23  ;;  %v62_v33 = vadd.f32 5.0, %v46_v24  ;;  %v50_v34 = vmul.f32 5.0, %v34_v25  ;;  %v51_v35 = vmul.f32 5.0, %v35_v26  ;;  %v52_v36 = vmul.f32 5.0, %v36_v31 }
  0x18   :  { %v38_v37 = vld [vmem:[#allocation2 + $0x78] sm:$0xff]  ;;  %77 = vst [vmem:[#allocation5 + $0x30] sm:$0xff] %v61_v27  ;;  %v63_v38 = vadd.f32 5.0, %v47_v28  ;;  %v64_v39 = vadd.f32 5.0, %v48_v29  ;;  %v65_v40 = vadd.f32 5.0, %v49_v30  ;;  %v53_v41 = vmul.f32 5.0, %v37_v32 }
  0x19   :  { %78 = vst [vmem:[#allocation5 + $0x38] sm:$0xff] %v62_v33  ;;  %v66_v42 = vadd.f32 5.0, %v50_v34  ;;  %v67_v43 = vadd.f32 5.0, %v51_v35  ;;  %v68_v44 = vadd.f32 5.0, %v52_v36  ;;  %v54_v45 = vmul.f32 5.0, %v38_v37 }
  0x1a   :  { %79 = vst [vmem:[#allocation5 + $0x40] sm:$0xff] %v63_v38  ;;  %80 = vst [vmem:[#allocation5 + $0x48] sm:$0xff] %v64_v39  ;;  %v69_v46 = vadd.f32 5.0, %v53_v41 }
  0x1b   :  { %81 = vst [vmem:[#allocation5 + $0x50] sm:$0xff] %v65_v40  ;;  %82 = vst [vmem:[#allocation5 + $0x58] sm:$0xff] %v66_v42  ;;  %v70_v47 = vadd.f32 5.0, %v54_v45 }
  0x1c   :  { %83 = vst [vmem:[#allocation5 + $0x60] sm:$0xff] %v67_v43  ;;  %84 = vst [vmem:[#allocation5 + $0x68] sm:$0xff] %v68_v44 }
  0x1d   :  { %85 = vst [vmem:[#allocation5 + $0x70] sm:$0xff] %v69_v46  ;;  %86 = vst [vmem:[#allocation5 + $0x78] sm:$0xff] %v70_v47 }
  0x1e   :  { %91 = vsyncadd [#allocation4], 1792  ;;  %s155_s0 = smov [#allocation5]  }
  0x1f   :  { %s92_s14 = sshll.u32 %s155_s0, 4  ;;  %s93_s14 = int_to_ptr.vmem [resolvable:$true] %s92_s14 }
  0x20   :  { %s128_s15 = scalar_lea.vmem %s93_s14, 256  ;;  %s132_s16 = scalar_lea.vmem %s93_s14, 2048 }
  0x21   :  { %p129_p5 = scmp.ne.s32.totalorder %s93_s14, %s128_s15  ;;  %p133_p6 = scmp.lt.s32.totalorder %s93_s14, %s93_s14 }
  0x22   :  { %p134_p7 = scmp.lt.s32.totalorder %s132_s16, %s128_s15 }
  0x24   :  { %p135_p8 = por %p134_p7, %p133_p6 }
  0x26   :  { %p136_p9 = pnand %p135_p8, %p129_p5 }
  0x28   :  { %139 = shalt.err (!%p136_p9)
}
  0x29   :  { %98 = dma.vmem_to_hbm [thread:$0]  %s93_s14, 256, %s179_s1, [#allocation4], %s153_s10, %s153_s10, %s154_s11  }
  0x2a   :  { %150 = dma.done.wait [#allocation4], 2048  }
  0x2b   :  { %151 = vsyncadd [#allocation4], 4294965248 }
  0x2c   :  { %102 = vsyncpa [#allocation3], 1 }
  0x2d   :  { %103 = vsyncpa [#allocation4], 1 }

</bundles_post_ra>
